<compile_context>
chip_gen: v6e
topology: v6e:2x2x1
jax: 0.10.0
libtpu: 0.0.40
codegen_flags: <defaults>
</compile_context>

<pallas_src>
import functools

import jax
import jax.numpy as jnp
from jax.experimental import pallas as pl
from jax.experimental.pallas import tpu as pltpu


def _listnet_block_kernel(student_ref, teacher_ref, partial_ref, *, n_rows):
    """One (TM, N) row block -> numerator partial sum in lane 0 of (8,128)."""
    tm, n = student_ref.shape
    row_offset = pl.program_id(0) * tm

    s = student_ref[...].astype(jnp.float32)
    t = teacher_ref[...].astype(jnp.float32)

    # Diagonal mask: one full-size lane iota + a tiny (tm, 1) sublane iota.
    col = jax.lax.broadcasted_iota(jnp.int32, (tm, n), 1)
    row = row_offset + jax.lax.broadcasted_iota(jnp.int32, (tm, 1), 0)
    diag = col == row                        # (tm, n)
    valid_row = row < n_rows                 # (tm, 1): masks padded rows of a
                                             # partial last block.

    # Large finite negative instead of -inf: exp() still underflows to exactly
    # 0 on the diagonal, s_shift stays finite, so t_exp * s_shift is exactly 0
    # there -> no 0*(-inf) NaN hazard and no extra full-tile select.
    big_neg = jnp.float32(jnp.finfo(jnp.float32).min / 2)
    s = jnp.where(diag, big_neg, s)
    t = jnp.where(diag, big_neg, t)

    # Student log-softmax pieces (full tile: one subtract, one exp).
    s_shift = s - jnp.max(s, axis=-1, keepdims=True)                 # (tm, n)
    log_z_s = jnp.log(jnp.sum(jnp.exp(s_shift), axis=-1, keepdims=True))

    # Teacher softmax folded into (tm, 1) row scalars:
    #   sum_j q_j * p_j = (1/T) * sum_j t_exp_j * s_shift_j - logZ_s
    # (valid because sum_j q_j == 1 per row).  q is never materialized.
    t_exp = jnp.exp(t - jnp.max(t, axis=-1, keepdims=True))          # (tm, n)
    t_sum = jnp.sum(t_exp, axis=-1, keepdims=True)                   # (tm, 1)
    weighted = jnp.sum(t_exp * s_shift, axis=-1, keepdims=True)      # (tm, 1)
    num_rows = weighted / t_sum - log_z_s                            # (tm, 1)

    # Padded rows may have read unspecified block padding -> drop them with a
    # select (keeps any garbage NaN/inf out of the accumulation).
    num_p = jnp.sum(jnp.where(valid_row, num_rows, jnp.float32(0.0)))

    # Lane-dense partial output: num in lane 0, rest zero.
    lane = jax.lax.broadcasted_iota(jnp.int32, (8, 128), 1)
    partial_ref[0] = jnp.where(lane == 0, num_p, jnp.float32(0.0))


def _pick_row_block(n):
    """Pick TM: ~2 MiB f32 per input tile, >=2 and even #blocks when N > 8."""
    budget_elems = (2 << 20) // 4            # ~2 MiB of f32 per (tm, n) tile
    tm_budget = max(8, min(1024, budget_elems // max(n, 1)))
    tm_budget -= tm_budget % 8

    if n <= 8:
        return n                             # single full block; unavoidable

    nb = pl.cdiv(n, min(tm_budget, n))
    # Megacore-friendly: at least 2 blocks, and an even count so v7x's two
    # TensorCores get balanced halves of the "parallel" grid axis.
    if nb == 1:
        nb = 2
    if nb % 2 == 1:
        nb += 1
    tm = pl.cdiv(n, nb)
    tm = ((tm + 7) // 8) * 8                 # sublane-aligned
    return tm


def listnet_forward(student_top1_sim_pred, teacher_top1_sim_pred, *,
                    tau=0.05, gamma_=0.10, tm=None):
    """ListNet.forward: gamma_ * (-(q*p).nansum() / q.nansum()).

    NOTE: `tau` only parametrizes the Similarity submodules that produce the
    similarity matrices upstream; the forward itself consumes precomputed
    [N, N] matrices.  Feed bf16 matrices from the producer if possible (the
    kernel upcasts in VMEM); do not cast f32 inputs in the wrapper.
    """
    assert student_top1_sim_pred.shape == teacher_top1_sim_pred.shape
    n, m = student_top1_sim_pred.shape
    assert n == m and n > 1, "ListNet expects square [N, N] sims with N > 1"

    if tm is None:
        tm = _pick_row_block(n)
    assert tm == n or tm % 8 == 0, "row block must be a multiple of 8 (or == N)"
    nb = pl.cdiv(n, tm)

    s_bytes = n * n * student_top1_sim_pred.dtype.itemsize
    t_bytes = n * n * teacher_top1_sim_pred.dtype.itemsize
    cost = pl.CostEstimate(
        flops=10 * n * n,                    # selects/subs/mul/reductions
        transcendentals=2 * n * n,           # two exps per element pair
        bytes_accessed=s_bytes + t_bytes + nb * 8 * 128 * 4,
    )

    partials = pl.pallas_call(
        functools.partial(_listnet_block_kernel, n_rows=n),
        out_shape=jax.ShapeDtypeStruct((nb, 8, 128), jnp.float32),
        grid=(nb,),
        in_specs=[
            pl.BlockSpec((tm, n), lambda i: (i, 0)),
            pl.BlockSpec((tm, n), lambda i: (i, 0)),
        ],
        out_specs=pl.BlockSpec((1, 8, 128), lambda i: (i, 0, 0)),
        compiler_params=pltpu.CompilerParams(
            dimension_semantics=("parallel",),
            vmem_limit_bytes=48 << 20),      # 2 MiB tiles + f32 temps, all gens
        cost_estimate=cost,
    )(student_top1_sim_pred, teacher_top1_sim_pred)

    # Tiny epilogue in plain XLA: combine partials, divide by N (== q.nansum()
    # since every softmax row of q sums to 1), gamma_ scale.
    num = jnp.sum(partials[:, 0, 0])
    return jnp.float32(gamma_) * (-num / jnp.float32(n))


def listnet_reference(student, teacher, *, gamma_=0.10):
    student = student.astype(jnp.float32)
    teacher = teacher.astype(jnp.float32)
    n = student.shape[0]
    diag = jnp.eye(n, dtype=bool)
    s = jnp.where(diag, -jnp.inf, student)
    t = jnp.where(diag, -jnp.inf, teacher)
    p = jax.nn.log_softmax(s, axis=-1)
    q = jax.nn.softmax(t, axis=-1)
    qp = q * p
    num = jnp.sum(jnp.where(jnp.isnan(qp), 0.0, qp))
    den = jnp.sum(jnp.where(jnp.isnan(q), 0.0, q))
    return gamma_ * (-num / den)


if __name__ == "__main__":
    # ListNet constructor hyperparameters (deterministic, in-script).
    tau = 0.05
    gamma_ = 0.10

    key = jax.random.PRNGKey(0)
    k1, k2, k3, k4 = jax.random.split(key, 4)

    def cos_sim_matrix(e, temp):
        e = e / jnp.linalg.norm(e, axis=-1, keepdims=True)
        return (e @ e.T) / temp

    # --- Test 1: small batch (N=8, D=32), f32, single row block. ---
    emb_s = jax.random.normal(k1, (8, 32), dtype=jnp.float32)
    emb_t = jax.random.normal(k2, (8, 32), dtype=jnp.float32)
    s_small = cos_sim_matrix(emb_s, tau)          # student temp = tau
    t_small = cos_sim_matrix(emb_t, tau / 2.0)    # teacher temp = tau / 2

    loss = jax.block_until_ready(
        listnet_forward(s_small, t_small, tau=tau, gamma_=gamma_))
    ref = listnet_reference(s_small, t_small, gamma_=gamma_)
    assert jnp.allclose(loss, ref, rtol=2e-3, atol=1e-6), (loss, ref)

    # --- Test 2: larger N with a small explicit row block so the grid runs
    # several pipelined steps and the last block is partial (row masking). ---
    emb_s2 = jax.random.normal(k3, (256, 64), dtype=jnp.float32)
    emb_t2 = jax.random.normal(k4, (256, 64), dtype=jnp.float32)
    s_big = cos_sim_matrix(emb_s2, tau)
    t_big = cos_sim_matrix(emb_t2, tau / 2.0)

    loss2 = jax.block_until_ready(
        listnet_forward(s_big, t_big, tau=tau, gamma_=gamma_, tm=96))
    ref2 = listnet_reference(s_big, t_big, gamma_=gamma_)
    assert jnp.allclose(loss2, ref2, rtol=2e-3, atol=1e-6), (loss2, ref2)

    # --- Test 2b: auto-picked TM (even #blocks for v7x megacore). ---
    loss2b = jax.block_until_ready(
        listnet_forward(s_big, t_big, tau=tau, gamma_=gamma_))
    assert jnp.allclose(loss2b, ref2, rtol=2e-3, atol=1e-6), (loss2b, ref2)

    # --- Test 3: bf16-streamed inputs (half HBM bytes); f32 math in-kernel. ---
    s_bf16 = s_small.astype(jnp.bfloat16)
    t_bf16 = t_small.astype(jnp.bfloat16)
    loss3 = jax.block_until_ready(
        listnet_forward(s_bf16, t_bf16, tau=tau, gamma_=gamma_))
    ref3 = listnet_reference(s_bf16, t_bf16, gamma_=gamma_)
    assert jnp.allclose(loss3, ref3, rtol=2e-3, atol=1e-6), (loss3, ref3)

    print("KERNEL_OK")
</pallas_src>

<mosaic_0001>
module attributes {stable_mosaic.version = 11 : i64} {
  func.func @_listnet_block_kernel(%arg0: i32, %arg1: memref<8x8xf32, #tpu.memory_space<vmem>>, %arg2: memref<8x8xf32, #tpu.memory_space<vmem>>, %arg3: memref<1x8x128xf32, #tpu.memory_space<vmem>>) attributes {dimension_semantics = [#tpu.dimension_semantics<parallel>], iteration_bounds = array<i64: 1>, scalar_prefetch = 0 : i64, scratch_operands = 0 : i64, tpu.core_type = #tpu.core_type<tc>, window_params = [{transform_indices = @transform_0, window_bounds = array<i64: 8, 8>}, {transform_indices = @transform_1, window_bounds = array<i64: 8, 8>}, {transform_indices = @transform_2, window_bounds = array<i64: 1, 8, 128>}]} {
    %c8_i32 = arith.constant 8 : i32
    %0 = arith.muli %arg0, %c8_i32 : i32
    %c0 = arith.constant 0 : index
    %c0_0 = arith.constant 0 : index
    %1 = vector.load %arg1[%c0, %c0_0] : memref<8x8xf32, #tpu.memory_space<vmem>>, vector<8x8xf32>
    %c0_1 = arith.constant 0 : index
    %c0_2 = arith.constant 0 : index
    %2 = vector.load %arg2[%c0_1, %c0_2] : memref<8x8xf32, #tpu.memory_space<vmem>>, vector<8x8xf32>
    %3 = tpu.iota {dimensions = array<i32: 1>} : vector<8x8xi32>
    %4 = tpu.iota {dimensions = array<i32: 0>} : vector<8x1xi32>
    %5 = vector.broadcast %0 : i32 to vector<8x1xi32>
    %6 = arith.addi %5, %4 : vector<8x1xi32>
    %7 = vector.broadcast %6 : vector<8x1xi32> to vector<8x8xi32>
    %8 = arith.cmpi eq, %3, %7 : vector<8x8xi32>
    %c8_i32_3 = arith.constant 8 : i32
    %9 = vector.broadcast %c8_i32_3 : i32 to vector<8x1xi32>
    %10 = arith.cmpi slt, %6, %9 : vector<8x1xi32>
    %cst = arith.constant -1.70141173E+38 : f32
    %11 = vector.broadcast %cst : f32 to vector<8x8xf32>
    %12 = arith.select %8, %11, %1 : vector<8x8xi1>, vector<8x8xf32>
    %cst_4 = arith.constant -1.70141173E+38 : f32
    %13 = vector.broadcast %cst_4 : f32 to vector<8x8xf32>
    %14 = arith.select %8, %13, %2 : vector<8x8xi1>, vector<8x8xf32>
    %cst_5 = arith.constant dense<0xFF800000> : vector<8xf32>
    %15 = vector.multi_reduction <maximumf>, %12, %cst_5 [1] : vector<8x8xf32> to vector<8xf32>
    %16 = vector.shape_cast %15 : vector<8xf32> to vector<8x1xf32>
    %17 = vector.broadcast %16 : vector<8x1xf32> to vector<8x8xf32>
    %18 = arith.subf %12, %17 : vector<8x8xf32>
    %19 = math.exp %18 : vector<8x8xf32>
    %cst_6 = arith.constant dense<0.000000e+00> : vector<8xf32>
    %20 = vector.multi_reduction <add>, %19, %cst_6 [1] : vector<8x8xf32> to vector<8xf32>
    %21 = vector.shape_cast %20 : vector<8xf32> to vector<8x1xf32>
    %22 = math.log %21 : vector<8x1xf32>
    %cst_7 = arith.constant dense<0xFF800000> : vector<8xf32>
    %23 = vector.multi_reduction <maximumf>, %14, %cst_7 [1] : vector<8x8xf32> to vector<8xf32>
    %24 = vector.shape_cast %23 : vector<8xf32> to vector<8x1xf32>
    %25 = vector.broadcast %24 : vector<8x1xf32> to vector<8x8xf32>
    %26 = arith.subf %14, %25 : vector<8x8xf32>
    %27 = math.exp %26 : vector<8x8xf32>
    %cst_8 = arith.constant dense<0.000000e+00> : vector<8xf32>
    %28 = vector.multi_reduction <add>, %27, %cst_8 [1] : vector<8x8xf32> to vector<8xf32>
    %29 = vector.shape_cast %28 : vector<8xf32> to vector<8x1xf32>
    %30 = arith.mulf %27, %18 : vector<8x8xf32>
    %cst_9 = arith.constant dense<0.000000e+00> : vector<8xf32>
    %31 = vector.multi_reduction <add>, %30, %cst_9 [1] : vector<8x8xf32> to vector<8xf32>
    %32 = vector.shape_cast %31 : vector<8xf32> to vector<8x1xf32>
    %33 = arith.divf %32, %29 : vector<8x1xf32>
    %34 = arith.subf %33, %22 : vector<8x1xf32>
    %cst_10 = arith.constant 0.000000e+00 : f32
    %35 = vector.broadcast %cst_10 : f32 to vector<8x1xf32>
    %36 = arith.select %10, %34, %35 : vector<8x1xi1>, vector<8x1xf32>
    %37 = vector.shape_cast %36 : vector<8x1xf32> to vector<1x8x1xf32>
    %cst_11 = arith.constant dense<0.000000e+00> : vector<1xf32>
    %38 = vector.multi_reduction <add>, %37, %cst_11 [1, 2] : vector<1x8x1xf32> to vector<1xf32>
    %39 = vector.shape_cast %38 : vector<1xf32> to vector<1x1x1xf32>
    %40 = vector.extract %39[0, 0, 0] : f32 from vector<1x1x1xf32>
    %41 = tpu.iota {dimensions = array<i32: 1>} : vector<8x128xi32>
    %c0_i32 = arith.constant 0 : i32
    %42 = vector.broadcast %c0_i32 : i32 to vector<8x128xi32>
    %43 = arith.cmpi eq, %41, %42 : vector<8x128xi32>
    %cst_12 = arith.constant 0.000000e+00 : f32
    %44 = vector.broadcast %40 : f32 to vector<8x128xf32>
    %45 = vector.broadcast %cst_12 : f32 to vector<8x128xf32>
    %46 = arith.select %43, %44, %45 : vector<8x128xi1>, vector<8x128xf32>
    %c0_13 = arith.constant 0 : index
    %c0_14 = arith.constant 0 : index
    %c0_15 = arith.constant 0 : index
    %47 = vector.load %arg3[%c0_13, %c0_14, %c0_15] : memref<1x8x128xf32, #tpu.memory_space<vmem>>, vector<1x8x128xf32>
    %48 = vector.shape_cast %47 : vector<1x8x128xf32> to vector<8x128xf32>
    %49 = vector.shape_cast %46 : vector<8x128xf32> to vector<1x8x128xf32>
    tpu.vector_store %arg3[%c0_13, %c0_14, %c0_15], %49 {strides = array<i32>} : memref<1x8x128xf32, #tpu.memory_space<vmem>>, vector<1x8x128xf32>,
    return
  }
  func.func @transform_0(%arg0: i32) -> (i32, i32) {
    %c0_i32 = arith.constant 0 : i32
    %c0_i32_0 = arith.constant 0 : i32
    return %arg0, %c0_i32 : i32, i32
  }
  func.func @transform_1(%arg0: i32) -> (i32, i32) {
    %c0_i32 = arith.constant 0 : i32
    %c0_i32_0 = arith.constant 0 : i32
    return %arg0, %c0_i32 : i32, i32
  }
  func.func @transform_2(%arg0: i32) -> (i32, i32, i32) {
    %c0_i32 = arith.constant 0 : i32
    %c0_i32_0 = arith.constant 0 : i32
    %c0_i32_1 = arith.constant 0 : i32
    return %arg0, %c0_i32, %c0_i32_0 : i32, i32, i32
  }
}

</mosaic_0001>

<bundles_post_ra>
// kernel: tpu_custom_call.1
= control target key start
LH: loop header
LB: loop body
LE: loop exit
PB: predicated region body
PF: predicated region fallthrough
CT: control target
= control target key end

     0   :  { %7 = vsyncpa [#allocation3], 0  ;;  %s220_s0 = inlined_call_operand.hbm [shape: f32[8,8], index: 0, kind: input, shape index: {}]   ;;  %s221_s1 = inlined_call_operand.hbm [shape: f32[8,8], index: 1, kind: input, shape index: {}]   ;;  %s222_s2 = inlined_call_operand.hbm [shape: f32[1,8,128], index: 2, kind: output, shape index: {}]  }
   0x1   :  { %8 = vsyncpa [#allocation6], 0 }
   0x2   :  { %9 = vsyncpa [#allocation4], 0  ;;  %s188_s9 = smov [#allocation2]   ;;  %s189_s11 = smov [#allocation5]  }
   0x3   :  { %s16_s10 = sshll.u32 %s188_s9, 4  ;;  %s26_s12 = sshll.u32 %s189_s11, 4  ;;  %s17_s10 = int_to_ptr.vmem [resolvable:$true] %s16_s10  ;;  %s27_s12 = int_to_ptr.vmem [resolvable:$true] %s26_s12 }
   0x4   :  { %s130_s13 = scalar_lea.vmem %s17_s10, 128  ;;  %p135_p1 = scmp.lt.s32.totalorder %s17_s10, %s17_s10 }
   0x5   :  { %p131_p0 = scmp.ne.s32.totalorder %s17_s10, %s130_s13  ;;  %p136_p2 = scmp.lt.s32.totalorder %s130_s13, %s130_s13 }
   0x7   :  { %p137_p3 = por %p136_p2, %p135_p1 }
   0x9   :  { %p138_p4 = pnand %p137_p3, %p131_p0 }
   0xb   :  { %141 = shalt.err (!%p138_p4)
}
   0xc   :  { %19 = dma.hbm_to_vmem [thread:$0]  %s220_s0, 128, %s17_s10, [#allocation3]  }
   0xd   :  { %s150_s16 = scalar_lea.vmem %s27_s12, 128  ;;  %p155_p6 = scmp.lt.s32.totalorder %s27_s12, %s27_s12 }
   0xe   :  { %p151_p5 = scmp.ne.s32.totalorder %s27_s12, %s150_s16  ;;  %p156_p7 = scmp.lt.s32.totalorder %s150_s16, %s150_s16 }
  0x10   :  { %p157_p8 = por %p156_p7, %p155_p6 }
  0x12   :  { %p158_p9 = pnand %p157_p8, %p151_p5 }
  0x14   :  { %161 = shalt.err (!%p158_p9)
}
  0x15   :  { %29 = dma.hbm_to_vmem [thread:$0]  %s221_s1, 128, %s27_s12, [#allocation6]  }
  0x16   :  { %182 = dma.done.wait [#allocation3], 128  }
  0x17   :  { %183 = vsyncadd [#allocation3], 4294967168 }
  0x18   :  { %184 = dma.done.wait [#allocation6], 128  }
  0x19   :  { %185 = vsyncadd [#allocation6], 4294967168  ;;  %v39_v0 = vlaneseq  ;;  %vm49_vm1 = vcmask 64512   ;;  %v37_v3 = vld [vmem:[#allocation2] sm:$0xff]  ;;  %v38_v4 = vld [vmem:[#allocation5] sm:$0xff]  ;;  %vm78_vm2 = vcmask 7168  }
  0x1a   :  { %s190_s0 = smov [#allocation7]  }
  0x1b   :  { %v40_v1 = vand.u32 127, %v39_v0  ;;  %v42_v2 = vshrl.u32 %v39_v0, 7  ;;  %s99_s1 = sshll.u32 %s190_s0, 4  ;;  %s100_s1 = int_to_ptr.vmem [resolvable:$true] %s99_s1 }
  0x1c   :  { %s162_s20 = scalar_lea.vmem %s100_s1, 128  ;;  %p167_p11 = scmp.lt.s32.totalorder %s100_s1, %s100_s1 }
  0x1d   :  { %vm45_vm0 = vcmp.eq.s32.totalorder %v40_v1, %v42_v2  ;;  %vm89_vm3 = vcmp.eq.s32.totalorder %v40_v1, 0  ;;  %p163_p10 = scmp.ne.s32.totalorder %s100_s1, %s162_s20  ;;  %p168_p12 = scmp.lt.s32.totalorder %s162_s20, %s162_s20 }
  0x1e   :  { %v47_v5 = vsel %vm45_vm0, -1.7014117e+38, %v37_v3  ;;  %v48_v6 = vsel %vm45_vm0, -1.7014117e+38, %v38_v4 }
  0x1f   :  { %v50_v7 = vsel %vm49_vm1, %v47_v5, -inf  ;;  %v61_v8 = vsel %vm49_vm1, %v48_v6, -inf  ;;  %p169_p13 = por %p168_p12, %p167_p11 }
  0x20   :  { %51 = vmax.xlane.f32.xlu0 %v50_v7 }
  0x21   :  { %p170_p0 = pnand %p169_p13, %p163_p10 }
  0x24   :  { %62 = vmax.xlane.f32.xlu0 %v61_v8 }
  0xa9   :  { %v52_v9 = vpop.xlane.xlu0 %51 }
  0xaa   :  { %v53_v10 = vsub.f32 %v47_v5, %v52_v9 }
  0xac   :  { %v54_v11 = vmul.f32 1.442695, %v53_v10 }
  0xad   :  { %v63_v12 = vpop.xlane.xlu0 %62 }
  0xae   :  { %114 = vpow2.f32 %v54_v11  ;;  %v64_v13 = vsub.f32 %v48_v6, %v63_v12 }
  0xb0   :  { %v65_v14 = vmul.f32 1.442695, %v64_v13 }
  0xb2   :  { %116 = vpow2.f32 %v65_v14 }
  0xbb   :  { %v115_v15 = vpop.eup %114 }
  0xbc   :  { %v56_v16 = vsel %vm49_vm1, %v115_v15, 0.0 }
  0xbd   :  { %57 = vadd.xlane.f32.xlu1 %v56_v16 }
  0xbf   :  { %v117_v17 = vpop.eup %116 }
  0xc0   :  { %v67_v18 = vsel %vm49_vm1, %v117_v17, 0.0  ;;  %v70_v19 = vmul.f32 %v117_v17, %v53_v10 }
  0xc1   :  { %68 = vadd.xlane.f32.xlu1 %v67_v18 }
  0xc2   :  { %v71_v20 = vsel %vm49_vm1, %v70_v19, 0.0 }
  0xc3   :  { %72 = vadd.xlane.f32.xlu0 %v71_v20 }
 0x146   :  { %v58_v21 = vpop.xlane.xlu1 %57 }
 0x147   :  { %118 = vlog2.f32 %v58_v21 }
 0x14a   :  { %v69_v22 = vpop.xlane.xlu1 %68 }
 0x14b   :  { %120 = vrcp.f32 %v69_v22 }
 0x14c   :  { %v73_v25 = vpop.xlane.xlu0 %72 }
 0x154   :  { %v119_v23 = vpop.eup %118 }
 0x155   :  { %v60_v26 = vmul.f32 0.6931472, %v119_v23 }
 0x158   :  { %v121_v24 = vpop.eup %120 }
 0x159   :  { %v75_v27 = vmul.f32 %v121_v24, %v73_v25 }
 0x15b   :  { %v76_v28 = vsub.f32 %v75_v27, %v60_v26 }
 0x15d   :  { %v79_v29 = vsel %vm78_vm2, %v76_v28, 0.0 }
 0x15e   :  { %80 = vadd.xlane.f32.xlu1 %v79_v29 }
 0x1e7   :  { %v81_v30 = vpop.xlane.xlu1 %80 }
 0x1e8   :  { %v82_v31 = vrot.slane %v81_v30, 4 }
 0x1ea   :  { %v83_v32 = vadd.f32 %v82_v31, %v81_v30 }
 0x1ec   :  { %v84_v33 = vrot.slane %v83_v32, 2 }
 0x1ee   :  { %v85_v34 = vadd.f32 %v84_v33, %v83_v32 }
 0x1f0   :  { %v86_v35 = vrot.slane %v85_v34, 1 }
 0x1f2   :  { %v87_v36 = vadd.f32 %v86_v35, %v85_v34 }
 0x1f4   :  { %109 = vpush %v87_v36 }
 0x225   :  { %s110_s19 = spop %109 }
 0x226   :  { %v90_v37 = vstv %s110_s19 }
 0x227   :  { %v91_v38 = vsel %vm89_vm3, %v90_v37, 0.0 }
 0x228   :  { %92 = vst [vmem:[#allocation7] sm:$0xff] %v91_v38 }
 0x229   :  { %173 = shalt.err (!%p170_p0)
}
 0x22a   :  { %102 = dma.vmem_to_hbm [thread:$0]  %s100_s1, 128, %s222_s2, [#allocation4]  }
 0x22b   :  { %186 = dma.done.wait [#allocation4], 128  }
 0x22c   :  { %187 = vsyncadd [#allocation4], 4294967168 }
 0x22d   :  { %106 = vsyncpa [#allocation3], 1 }
 0x22e   :  { %107 = vsyncpa [#allocation6], 1 }
 0x22f   :  { %108 = vsyncpa [#allocation4], 1 }

</bundles_post_ra>
